<compile_context>
chip_gen: v7x
topology: tpu7x:2x2x1
jax: 0.10.0
libtpu: 0.0.40
codegen_flags: <defaults>
</compile_context>

<pallas_src>
import numpy as np
import jax
import jax.numpy as jnp
from jax.experimental import pallas as pl
from jax.experimental.pallas import tpu as pltpu

EMBEDDING_SIZE = 640
N_CATEGORY = 5                             # len(cfg.inst_list); 2**5 == 32 conditions
N_CONDITIONS = 2 ** N_CATEGORY             # 32
MASK_LEN = EMBEDDING_SIZE // N_CATEGORY    # 128 -> lane-aligned stripes


def bin2list(i, n):
    # MSB-first binary expansion of i into n bits (matches the PyTorch module).
    return [(i >> (n - 1 - b)) & 1 for b in range(n)]


def build_mask_table():
    # Pure-JAX reference only; the kernel never touches this table.
    mask_array = np.zeros([N_CONDITIONS, EMBEDDING_SIZE], dtype=np.float32)
    for i in range(N_CONDITIONS):
        cond = bin2list(i, N_CATEGORY)
        for idx, case in enumerate(cond):
            if case == 1:
                mask_array[i, idx * MASK_LEN:(idx + 1) * MASK_LEN] = 1.0
    return jnp.asarray(mask_array)


def _csn_kernel(x_ref, c_ref, o_ref):
    # x_ref/o_ref: (TB, 640) float tiles, c_ref: (TB, 1) int32 condition indices.
    c = c_ref[...]                                             # (TB, 1) int32
    # Stripe-wise multiply: 128-wide slices are exact lane tiles (free views).
    # bit[r] = ((c[r] >> (N_CATEGORY-1-idx)) & 1)  -- MSB-first bin2list order.
    for idx in range(N_CATEGORY):
        bit = ((c >> (N_CATEGORY - 1 - idx)) & 1).astype(x_ref.dtype)   # (TB, 1)
        lo = idx * MASK_LEN
        hi = lo + MASK_LEN
        o_ref[:, lo:hi] = x_ref[:, lo:hi] * bit                # lane-broadcast


def _round_up(x, m):
    return ((x + m - 1) // m) * m


def conditional_simnet_forward(embedded_x, c, *, block_b=1024):
    """embedded_x: (B, 640) float, c: (B,) int in [0, 32). Returns (B, 640)."""
    B, E = embedded_x.shape
    assert E == EMBEDDING_SIZE, "embedding size must be 640 (5 stripes of 128)"

    c2 = c.astype(jnp.int32).reshape(B, 1)

    # Batch tile selection:
    #   * B <= 8: single block equal to the full array (allowed block shape).
    #   * otherwise: cap the tile so the grid has ~>=4 steps (lets the
    #     "parallel" axis shard across both v7x TensorCores and keeps the
    #     double-buffered pipeline fed), multiple of 8 for sublane alignment,
    #     never above block_b (sweep 512/1024/2048 on real workloads).
    if B <= 8:
        tb = B
    else:
        tb = min(block_b, _round_up(pl.cdiv(B, 4), 8))
        tb = max(tb, 8)
        assert tb % 8 == 0

    grid = (pl.cdiv(B, tb),)

    itemsize = jnp.dtype(embedded_x.dtype).itemsize
    cost = pl.CostEstimate(
        flops=B * E,
        transcendentals=0,
        bytes_accessed=2 * B * E * itemsize + 4 * B,
    )

    return pl.pallas_call(
        _csn_kernel,
        out_shape=jax.ShapeDtypeStruct((B, E), embedded_x.dtype),
        grid_spec=pl.GridSpec(
            grid=grid,
            in_specs=[
                pl.BlockSpec((tb, E), lambda i: (i, 0)),   # embedded_x rows
                pl.BlockSpec((tb, 1), lambda i: (i, 0)),   # condition indices
            ],
            out_specs=pl.BlockSpec((tb, E), lambda i: (i, 0)),
        ),
        compiler_params=pltpu.CompilerParams(
            # Rows are independent -> shard the batch axis across TensorCores.
            dimension_semantics=("parallel",)),
        cost_estimate=cost,
    )(embedded_x, c2)


if __name__ == "__main__":
    key = jax.random.PRNGKey(0)
    kx, kc = jax.random.split(key)

    mask_table = build_mask_table()

    # Case 1: small batch -> tb=8, 2 grid steps (exercises multi-step path).
    B1 = 16
    x1 = jax.random.normal(kx, (B1, EMBEDDING_SIZE), dtype=jnp.float32)
    c1 = jax.random.randint(kc, (B1,), 0, N_CONDITIONS, dtype=jnp.int32)
    out1 = jax.block_until_ready(conditional_simnet_forward(x1, c1))
    ref1 = x1 * mask_table[c1]
    assert out1.shape == (B1, EMBEDDING_SIZE) and out1.dtype == jnp.float32
    np.testing.assert_allclose(np.asarray(out1), np.asarray(ref1), rtol=0, atol=0)

    # Case 2: batch not a multiple of the tile + small block_b override
    # (exercises the partial-final-block writeback path).
    B2 = 40
    kx2, kc2 = jax.random.split(kc)
    x2 = jax.random.normal(kx2, (B2, EMBEDDING_SIZE), dtype=jnp.float32)
    c2 = jax.random.randint(kc2, (B2,), 0, N_CONDITIONS, dtype=jnp.int32)
    out2 = jax.block_until_ready(conditional_simnet_forward(x2, c2, block_b=16))
    ref2 = x2 * mask_table[c2]
    np.testing.assert_allclose(np.asarray(out2), np.asarray(ref2), rtol=0, atol=0)

    # Case 3: tiny batch, single full-array block.
    B3 = 4
    kx3, kc3 = jax.random.split(kc2)
    x3 = jax.random.normal(kx3, (B3, EMBEDDING_SIZE), dtype=jnp.float32)
    c3 = jax.random.randint(kc3, (B3,), 0, N_CONDITIONS, dtype=jnp.int32)
    out3 = jax.block_until_ready(conditional_simnet_forward(x3, c3))
    ref3 = x3 * mask_table[c3]
    np.testing.assert_allclose(np.asarray(out3), np.asarray(ref3), rtol=0, atol=0)

    print("KERNEL_OK")
</pallas_src>

<mosaic_0001>
module attributes {stable_mosaic.version = 11 : i64} {
  func.func @_csn_kernel(%arg0: i32, %arg1: memref<8x640xf32, #tpu.memory_space<vmem>>, %arg2: memref<8x1xi32, #tpu.memory_space<vmem>>, %arg3: memref<8x640xf32, #tpu.memory_space<vmem>>) attributes {dimension_semantics = [#tpu.dimension_semantics<parallel>], iteration_bounds = array<i64: 2>, scalar_prefetch = 0 : i64, scratch_operands = 0 : i64, tpu.core_type = #tpu.core_type<tc>, window_params = [{transform_indices = @transform_0, window_bounds = array<i64: 8, 640>}, {transform_indices = @transform_1, window_bounds = array<i64: 8, 1>}, {transform_indices = @transform_2, window_bounds = array<i64: 8, 640>}]} {
    %c0 = arith.constant 0 : index
    %c0_0 = arith.constant 0 : index
    %0 = vector.load %arg2[%c0, %c0_0] : memref<8x1xi32, #tpu.memory_space<vmem>>, vector<8x1xi32>
    %c4_i32 = arith.constant 4 : i32
    %1 = vector.broadcast %c4_i32 : i32 to vector<8x1xi32>
    %2 = arith.shrsi %0, %1 : vector<8x1xi32>
    %c1_i32 = arith.constant 1 : i32
    %3 = vector.broadcast %c1_i32 : i32 to vector<8x1xi32>
    %4 = arith.andi %2, %3 : vector<8x1xi32>
    %5 = arith.sitofp %4 : vector<8x1xi32> to vector<8x1xf32>
    %c0_1 = arith.constant 0 : index
    %c0_2 = arith.constant 0 : index
    %6 = vector.load %arg1[%c0_1, %c0_2] : memref<8x640xf32, #tpu.memory_space<vmem>>, vector<8x128xf32>
    %7 = vector.broadcast %5 : vector<8x1xf32> to vector<8x128xf32>
    %8 = arith.mulf %6, %7 : vector<8x128xf32>
    %c0_3 = arith.constant 0 : index
    %c0_4 = arith.constant 0 : index
    %9 = vector.load %arg3[%c0_3, %c0_4] : memref<8x640xf32, #tpu.memory_space<vmem>>, vector<8x128xf32>
    tpu.vector_store %arg3[%c0_3, %c0_4], %8 {strides = array<i32>} : memref<8x640xf32, #tpu.memory_space<vmem>>, vector<8x128xf32>,
    %c3_i32 = arith.constant 3 : i32
    %10 = vector.broadcast %c3_i32 : i32 to vector<8x1xi32>
    %11 = arith.shrsi %0, %10 : vector<8x1xi32>
    %c1_i32_5 = arith.constant 1 : i32
    %12 = vector.broadcast %c1_i32_5 : i32 to vector<8x1xi32>
    %13 = arith.andi %11, %12 : vector<8x1xi32>
    %14 = arith.sitofp %13 : vector<8x1xi32> to vector<8x1xf32>
    %c0_6 = arith.constant 0 : index
    %c128 = arith.constant 128 : index
    %15 = vector.load %arg1[%c0_6, %c128] : memref<8x640xf32, #tpu.memory_space<vmem>>, vector<8x128xf32>
    %16 = vector.broadcast %14 : vector<8x1xf32> to vector<8x128xf32>
    %17 = arith.mulf %15, %16 : vector<8x128xf32>
    %c0_7 = arith.constant 0 : index
    %c128_8 = arith.constant 128 : index
    %18 = vector.load %arg3[%c0_7, %c128_8] : memref<8x640xf32, #tpu.memory_space<vmem>>, vector<8x128xf32>
    tpu.vector_store %arg3[%c0_7, %c128_8], %17 {strides = array<i32>} : memref<8x640xf32, #tpu.memory_space<vmem>>, vector<8x128xf32>,
    %c2_i32 = arith.constant 2 : i32
    %19 = vector.broadcast %c2_i32 : i32 to vector<8x1xi32>
    %20 = arith.shrsi %0, %19 : vector<8x1xi32>
    %c1_i32_9 = arith.constant 1 : i32
    %21 = vector.broadcast %c1_i32_9 : i32 to vector<8x1xi32>
    %22 = arith.andi %20, %21 : vector<8x1xi32>
    %23 = arith.sitofp %22 : vector<8x1xi32> to vector<8x1xf32>
    %c0_10 = arith.constant 0 : index
    %c256 = arith.constant 256 : index
    %24 = vector.load %arg1[%c0_10, %c256] : memref<8x640xf32, #tpu.memory_space<vmem>>, vector<8x128xf32>
    %25 = vector.broadcast %23 : vector<8x1xf32> to vector<8x128xf32>
    %26 = arith.mulf %24, %25 : vector<8x128xf32>
    %c0_11 = arith.constant 0 : index
    %c256_12 = arith.constant 256 : index
    %27 = vector.load %arg3[%c0_11, %c256_12] : memref<8x640xf32, #tpu.memory_space<vmem>>, vector<8x128xf32>
    tpu.vector_store %arg3[%c0_11, %c256_12], %26 {strides = array<i32>} : memref<8x640xf32, #tpu.memory_space<vmem>>, vector<8x128xf32>,
    %c1_i32_13 = arith.constant 1 : i32
    %28 = vector.broadcast %c1_i32_13 : i32 to vector<8x1xi32>
    %29 = arith.shrsi %0, %28 : vector<8x1xi32>
    %c1_i32_14 = arith.constant 1 : i32
    %30 = vector.broadcast %c1_i32_14 : i32 to vector<8x1xi32>
    %31 = arith.andi %29, %30 : vector<8x1xi32>
    %32 = arith.sitofp %31 : vector<8x1xi32> to vector<8x1xf32>
    %c0_15 = arith.constant 0 : index
    %c384 = arith.constant 384 : index
    %33 = vector.load %arg1[%c0_15, %c384] : memref<8x640xf32, #tpu.memory_space<vmem>>, vector<8x128xf32>
    %34 = vector.broadcast %32 : vector<8x1xf32> to vector<8x128xf32>
    %35 = arith.mulf %33, %34 : vector<8x128xf32>
    %c0_16 = arith.constant 0 : index
    %c384_17 = arith.constant 384 : index
    %36 = vector.load %arg3[%c0_16, %c384_17] : memref<8x640xf32, #tpu.memory_space<vmem>>, vector<8x128xf32>
    tpu.vector_store %arg3[%c0_16, %c384_17], %35 {strides = array<i32>} : memref<8x640xf32, #tpu.memory_space<vmem>>, vector<8x128xf32>,
    %c0_i32 = arith.constant 0 : i32
    %37 = vector.broadcast %c0_i32 : i32 to vector<8x1xi32>
    %38 = arith.shrsi %0, %37 : vector<8x1xi32>
    %c1_i32_18 = arith.constant 1 : i32
    %39 = vector.broadcast %c1_i32_18 : i32 to vector<8x1xi32>
    %40 = arith.andi %38, %39 : vector<8x1xi32>
    %41 = arith.sitofp %40 : vector<8x1xi32> to vector<8x1xf32>
    %c0_19 = arith.constant 0 : index
    %c512 = arith.constant 512 : index
    %42 = vector.load %arg1[%c0_19, %c512] : memref<8x640xf32, #tpu.memory_space<vmem>>, vector<8x128xf32>
    %43 = vector.broadcast %41 : vector<8x1xf32> to vector<8x128xf32>
    %44 = arith.mulf %42, %43 : vector<8x128xf32>
    %c0_20 = arith.constant 0 : index
    %c512_21 = arith.constant 512 : index
    %45 = vector.load %arg3[%c0_20, %c512_21] : memref<8x640xf32, #tpu.memory_space<vmem>>, vector<8x128xf32>
    tpu.vector_store %arg3[%c0_20, %c512_21], %44 {strides = array<i32>} : memref<8x640xf32, #tpu.memory_space<vmem>>, vector<8x128xf32>,
    return
  }
  func.func @transform_0(%arg0: i32) -> (i32, i32) {
    %c0_i32 = arith.constant 0 : i32
    %c0_i32_0 = arith.constant 0 : i32
    return %arg0, %c0_i32 : i32, i32
  }
  func.func @transform_1(%arg0: i32) -> (i32, i32) {
    %c0_i32 = arith.constant 0 : i32
    %c0_i32_0 = arith.constant 0 : i32
    return %arg0, %c0_i32 : i32, i32
  }
  func.func @transform_2(%arg0: i32) -> (i32, i32) {
    %c0_i32 = arith.constant 0 : i32
    %c0_i32_0 = arith.constant 0 : i32
    return %arg0, %c0_i32 : i32, i32
  }
}

</mosaic_0001>

<bundles_post_ra>
// kernel: tpu_custom_call.1
= control target key start
LH: loop header
LB: loop body
LE: loop exit
PB: predicated region body
PF: predicated region fallthrough
CT: control target
= control target key end

     0   :  { %7 = vsyncpa [#allocation3], 0  ;;  %s678_s0 = inlined_call_operand.hbm [shape: f32[16,640], index: 0, kind: input, shape index: {}]   ;;  %s679_s1 = inlined_call_operand.vmem [shape: s32[16,1], index: 1, kind: input, shape index: {}]   ;;  %s680_s2 = inlined_call_operand.hbm [shape: f32[16,640], index: 2, kind: output, shape index: {}]  }
   0x1   :  { %9 = vsyncpa [#allocation3 + $0x1], 0 }
   0x2   :  { %10 = vsyncpa [#allocation4], 0 }
   0x3   :  { %12 = vsyncpa [#allocation4 + $0x1], 0  ;;  %s507_s9 = smov 0   ;;  %s509_s10 = smov 0  }
   0x4   :  { %s511_s11 = smov 0   ;;  %s513_s12 = smov 0  }
   0x5 LB: > { %s528_s13 = sadd.s32 4294967295, %s487_s12   ;;  %s329_s14 = sadd.s32 4294967294, %s487_s12   ;;  %s487_s12 = sphi %s513_s12, %s694_s12   ;;  %s483_s11 = sphi %s511_s11, %s693_s11   ;;  %s479_s10 = sphi %s509_s10, %s692_s10   ;;  %s475_s9 = sphi %s507_s9, %s691_s9  }
   0x6   : > { %s532_s15 = sadd.s32 1, %s487_s12   ;;  %s25_s16 = sadd.s32 1, %s483_s11 }
   0x7   : > { %s22_s17 = ssub.s32 %s487_s12, %s532_s15  ;;  %p32_p0 = scmp.ne.s32.totalorder %s483_s11, %s479_s10 }
   0x8   : > { %p23_p1 = scmp.eq.s32.totalorder %s22_s17, 0  ;;  %p33_p2 = scmp.eq.s32.totalorder %s487_s12, 0 }
   0x9   : > { %p38_p3 = scmp.ne.s32.totalorder %s479_s10, %s475_s9  ;;  %p39_p4 = scmp.eq.s32.totalorder %s528_s13, 0 }
   0xa   : > { %s544_s18 = scalar_select %p23_p1, %s483_s11, %s25_s16  }
   0xb   : > { %p34_p5 = por %p33_p2, %p32_p0  ;;  %p546_p6 = por %p39_p4, %p38_p3 }
   0xc   : > { %p88_p7 = scmp.eq.s32.totalorder %s528_s13, 1  ;;  %p94_p8 = scmp.eq.s32.totalorder %s329_s14, 1 }
   0xd   : > { %p354_p10 = scmp.lt.s32.totalorder %s487_s12, 2  ;;  %s114_s22 = sand.u32 1, %s483_s11  }
   0xe   : > { %p553_p11 = por %p88_p7, %p32_p0  ;;  %p557_p12 = por %p94_p8, %p38_p3 }
   0xf   : > { %s339_s23 = smul.u32 640, %s487_s12  ;;  %p568_p13 = pnand %p354_p10, %p34_p5 }
  0x10   : > { %s683_s20 = scalar_select %p553_p11, 1, 0 }
  0x11   : > { %s684_s21 = scalar_select %p557_p12, 1, 0 }
  0x12   : > { %s338_s24 = smul.u32 40, %s114_s22  ;;  %s566_s27 = scalar_lea.hbm %s678_s0, %s339_s23 }
  0x13   : > { %s115_s3 = scalar_lea.sflag [#allocation3], %s114_s22  ;;  %s391_s4 = scalar_lea.hbm %s566_s27, 640 }
  0x14   : > { %s118_s29 = scalar_lea.vmem [#allocation2], %s338_s24  ;;  %p392_p2 = scmp.ne.s32.totalorder %s566_s27, %s391_s4 }
  0x15   : > { %s126_s30 = sshll.u32 %s118_s29, 4  ;;  %p393_p3 = pneg %p568_p13  ;;  %s573_s30 = int_to_ptr.vmem [resolvable:$true] %s126_s30 }
  0x16   : > { %s396_s7 = scalar_lea.hbm %s678_s0, 1280  ;;  %p397_p7 = scmp.lt.u32.totalorder %s566_s27, %s678_s0 }
  0x17   : > { %p394_p4 = pnand %p393_p3, %p392_p2  ;;  %p398_p8 = scmp.lt.u32.totalorder %s396_s7, %s391_s4 }
  0x18   : > { %p400_p9 = scmp.lt.u32.totalorder %s391_s4, %s566_s27 }
  0x19   : > { %p395_p5 = pneg %p394_p4  ;;  %p399_p10 = por %p398_p8, %p397_p7 }
  0x1b   : > { %p401_p0 = por %p400_p9, %p399_p10 }
  0x1d   : > { %p402_p1 = pnand %p401_p0, %p395_p5 }
  0x1f   : > { %405 = shalt.err (!%p402_p1)
}
  0x20   : > { %s406_s16 = scalar_lea.vmem %s573_s30, 640  ;;  %s489_s17 = smov [#allocation2]  }
  0x21   : > { %p407_p2 = scmp.ne.s32.totalorder %s573_s30, %s406_s16  ;;  %s411_s22 = sshll.u32 %s489_s17, 4  ;;  %s412_s22 = int_to_ptr.vmem [resolvable:$false] %s411_s22 }
  0x22   : > { %s413_s23 = scalar_lea.vmem %s412_s22, 1280  ;;  %p414_p11 = scmp.lt.s32.totalorder %s573_s30, %s412_s22 }
  0x23   : > { %p409_p4 = pnand %p407_p2, %p393_p3  ;;  %p415_p7 = scmp.lt.s32.totalorder %s413_s23, %s406_s16 }
  0x25   : > { %p410_p12 = pneg %p409_p4  ;;  %p416_p8 = por %p415_p7, %p414_p11 }
  0x27   : > { %p417_p9 = pnand %p416_p8, %p410_p12 }
  0x29   : > { %420 = shalt.err (!%p417_p9)
}
  0x2a   : > { %349 = dma.hbm_to_vmem [thread:$0]  (!%p568_p13), %s566_s27, 640, %s573_s30, %s115_s3  }
  0x2b   : > { %p686_p0 = scmp.lt.s32.totalorder %s487_s12, 3  ;;  %p687_p1 = scmp.ge.s32.totalorder %s487_s12, 1 }
  0x2d   : > { %p139_p3 = pnand %p687_p1, %p686_p0 }
  0x2e   : > { %s606_s24 = sand.u32 (!%p139_p3), 1, %s479_s10  }
  0x2f   : > { %142 = sbr.rel (%p139_p3) target bundleno = 220 (0xdc), region = 28  ;;  %s145_s26 = scalar_lea.sflag (!%p139_p3), [#allocation3], %s606_s24 }
  0x30   : > { %s340_s25 = smul.u32 (!%p139_p3), 40, %s606_s24 }
  0x32   : > { %s612_s28 = scalar_lea.vmem (!%p139_p3), [#allocation2], %s340_s25 }
  0x36   : > { %466 = dma.done.wait (%p546_p6), %s145_s26, 640  }
  0x37   : > { %468 = vsyncadd (%p546_p6), %s145_s26, 4294966656  ;;  %p173_p11 = scmp.lt.s32.totalorder %s528_s13, 1  ;;  %v490_v0 = vmov 0   ;;  %v203_v16 = vld [vmem:[%s612_s28 + $0x10] sm:$0xff]  ;;  %v181_v17 = vld [vmem:[%s612_s28] sm:$0xff]  ;;  %s172_s19 = scalar_lea.vmem [#allocation5], %s340_s25 }
  0x38   : > { %390 = vset.pattern.permute.xlu1 %v490_v0  ;;  %389 = vset.pattern.permute.xlu0 %v490_v0  ;;  %v214_v22 = vld [vmem:[%s612_s28 + $0x18] sm:$0xff]  ;;  %v192_v23 = vld [vmem:[%s612_s28 + $0x8] sm:$0xff]  ;;  %s341_s5 = smul.u32 640, %s528_s13  ;;  %v224_v28 = vld [vmem:[%s612_s28 + $0x20] sm:$0xff]  ;;  %s247_s6 = sshll.u32 %s172_s19, 4  ;;  %s636_s6 = int_to_ptr.vmem [resolvable:$true] %s247_s6 }
  0x39   : > { %s174_s27 = scalar_select %p173_p11, %s528_s13, 1 }
  0x3a   : > { %s634_s14 = scalar_lea.hbm %s680_s2, %s341_s5  ;;  %s233_s16 = scalar_lea.sflag [#allocation4], %s606_s24 }
  0x3b   : > { %s334_s29 = sshll.u32 %s174_s27, 3  ;;  %s421_s17 = scalar_lea.vmem %s636_s6, 640 }
  0x3c   : > { %s176_s4 = scalar_lea.vmem %s679_s1, %s334_s29  ;;  %p422_p6 = scmp.ne.s32.totalorder %s636_s6, %s421_s17 }
  0x3d   : > { %v177_v1 = vld [vmem:[%s176_s4] sm:$0xff]  ;;  %p688_p12 = scmp.ne.s32.totalorder %s683_s20, 0  ;;  %s491_s13 = smov [#allocation5]  }
  0x3e   : > { %v200_v2 = vshra.s32 %v177_v1, 2  ;;  %v178_v3 = vshra.s32 %v177_v1, 4  ;;  %v211_v4 = vshra.s32 %v177_v1, 1  ;;  %v189_v5 = vshra.s32 %v177_v1, 3  ;;  %s425_s22 = sshll.u32 %s491_s13, 4  ;;  %s426_s22 = int_to_ptr.vmem [resolvable:$false] %s425_s22 }
  0x3f   : > { %v222_v14 = vand.u32 1, %v177_v1  ;;  %p423_p13 = pnand %p422_p6, %p688_p12  ;;  %s427_s23 = scalar_lea.vmem %s426_s22, 1280 }
  0x40   : > { %v201_v6 = vand.u32 1, %v200_v2  ;;  %v179_v7 = vand.u32 1, %v178_v3  ;;  %v212_v8 = vand.u32 1, %v211_v4  ;;  %v190_v9 = vand.u32 1, %v189_v5  ;;  %p428_p10 = scmp.lt.s32.totalorder %s636_s6, %s426_s22  ;;  %p429_p2 = scmp.lt.s32.totalorder %s427_s23, %s421_s17 }
  0x41   : > { %v223_v15 = vcvt.s32.f32 %v222_v14  ;;  %p424_p5 = pneg %p423_p13 }
  0x42   : > { %v202_v10 = vcvt.s32.f32 %v201_v6  ;;  %v180_v11 = vcvt.s32.f32 %v179_v7  ;;  %v213_v12 = vcvt.s32.f32 %v212_v8  ;;  %v191_v13 = vcvt.s32.f32 %v190_v9  ;;  %p430_p4 = por %p429_p2, %p428_p10 }
  0x44   : > { %206 = vperm.xlu1 %390, %v202_v10   ;;  %184 = vperm.xlu0 %389, %v180_v11   ;;  %p431_p7 = pnand %p430_p4, %p424_p5 }
  0x48   : > { %217 = vperm.xlu1 %390, %v213_v12   ;;  %195 = vperm.xlu0 %389, %v191_v13  }
  0x4c   : > { %227 = vperm.xlu0 %389, %v223_v15  }
  0xc3   : > { %v207_v18 = vpop.permute.xlu1 %206  ;;  %v185_v19 = vpop.permute.xlu0 %184 }
  0xc4   : > { %v209_v20 = vmul.f32 %v207_v18, %v203_v16  ;;  %v187_v21 = vmul.f32 %v185_v19, %v181_v17 }
  0xc6   : > { %210 = vst [vmem:[%s172_s19 + $0x10] sm:$0xff] %v209_v20  ;;  %188 = vst [vmem:[%s172_s19] sm:$0xff] %v187_v21 }
  0xc7   : > { %v218_v24 = vpop.permute.xlu1 %217  ;;  %v196_v25 = vpop.permute.xlu0 %195 }
  0xc8   : > { %v220_v26 = vmul.f32 %v218_v24, %v214_v22  ;;  %v198_v27 = vmul.f32 %v196_v25, %v192_v23 }
  0xca   : > { %221 = vst [vmem:[%s172_s19 + $0x18] sm:$0xff] %v220_v26  ;;  %199 = vst [vmem:[%s172_s19 + $0x8] sm:$0xff] %v198_v27 }
  0xcb   : > { %v228_v29 = vpop.permute.xlu0 %227 }
  0xcc   : > { %v230_v30 = vmul.f32 %v228_v29, %v224_v28 }
  0xce   : > { %231 = vst [vmem:[%s172_s19 + $0x20] sm:$0xff] %v230_v30 }
  0xcf   : > { %434 = shalt.err (!%p431_p7)
}
  0xd0   : > { %s435_s24 = scalar_lea.hbm %s634_s14, 640  ;;  %s439_s28 = scalar_lea.hbm %s680_s2, 1280 }
  0xd1   : > { %p436_p8 = scmp.ne.s32.totalorder %s634_s14, %s435_s24  ;;  %p440_p1 = scmp.lt.u32.totalorder %s634_s14, %s680_s2 }
  0xd2   : > { %p441_p3 = scmp.lt.u32.totalorder %s439_s28, %s435_s24  ;;  %p443_p6 = scmp.lt.u32.totalorder %s435_s24, %s634_s14 }
  0xd3   : > { %p437_p9 = pnand %p436_p8, %p688_p12 }
  0xd4   : > { %p442_p11 = por %p441_p3, %p440_p1 }
  0xd5   : > { %p438_p0 = pneg %p437_p9 }
  0xd6   : > { %p444_p13 = por %p443_p6, %p442_p11 }
  0xd8   : > { %p445_p5 = pnand %p444_p13, %p438_p0 }
  0xda   : > { %448 = shalt.err (!%p445_p5)
}
  0xdb   : > { %344 = dma.vmem_to_hbm [thread:$0]  (%p688_p12), %s636_s6, 640, %s634_s14, %s233_s16  }
  0xdc PF: > { %s259_s30 = sand.u32 1, %s475_s9   ;;  %p689_p10 = scmp.ne.s32.totalorder %s684_s21, 0 }
  0xdd   : > { %p690_p2 = scmp.ge.s32.totalorder %s487_s12, 2  ;;  %s260_s3 = scalar_lea.sflag [#allocation4], %s259_s30 }
  0xdf   : > { %p351_p4 = pnand %p690_p2, %p689_p10 }
  0xe1   : > { %470 = dma.done.wait (!%p351_p4), %s260_s3, 640  }
  0xe2   : > { %472 = vsyncadd (!%p351_p4), %s260_s3, 4294966656  ;;  %p15_p7 = scmp.ge.s32.totalorder %s532_s15, 4   ;;  %s691_s9 = smov %s479_s10 }
  0xe3   : > { %s692_s10 = smov %s483_s11  ;;  %s693_s11 = smov %s544_s18 }
  0xe4   : > { %s694_s12 = smov %s532_s15  ;;  %17 = sbr.rel (!%p15_p7) target bundleno = 5 (0x5), region = 76 }
  0xeb   :  { %265 = vsyncpa [#allocation3], 1 }
  0xec   :  { %267 = vsyncpa [#allocation3 + $0x1], 1 }
  0xed   :  { %268 = vsyncpa [#allocation4], 1 }
  0xee   :  { %270 = vsyncpa [#allocation4 + $0x1], 1 }

</bundles_post_ra>
